<compile_context>
chip_gen: v6e
topology: v6e:2x2x1
jax: 0.10.0
libtpu: 0.0.40
codegen_flags: <defaults>
</compile_context>

<pallas_src>
import functools

import jax
import jax.numpy as jnp
from jax.experimental import pallas as pl
from jax.experimental.pallas import tpu as pltpu

PRIMITIVES = ["skip", "conv", "conv_di", "conv_2x", "conv_2x_di"]


# ----------------------------- Pallas kernel -------------------------------
def _conv3x3_relu_kernel(x_ref, w_ref, o_ref, acc_ref, *, Nb, H, Wc):
    """Fused 3x3 conv (pad=1, stride=1) + ReLU for a block of Nb images.

    x_ref:   (Nb, H, W*C_in)       unpadded NHWC rows (f32 or bf16)
    w_ref:   (W*C_in, 3*W*C_out)   width-Toeplitz weight, one column slab per
                                   row-tap kh in {0,1,2}, bf16
    o_ref:   (Nb, H, W*C_out)      NHWC-contiguous output slab, bf16
    acc_ref: (Nb, H, W*C_out)      f32 VMEM accumulator scratch
    """
    K = x_ref.shape[-1]
    # One MXU matmul per grid step: M = Nb*H fully-aligned rows, all three
    # row-taps fused into the output (lane) dimension, f32 accumulation.
    x2 = x_ref[...].reshape(Nb * H, K).astype(jnp.bfloat16)
    y = jnp.dot(x2, w_ref[...], preferred_element_type=jnp.float32)
    y = y.reshape(Nb, H, 3 * Wc)

    # Per-tap partial outputs: lane-aligned 128-wide slices of the result.
    y_top = y[:, :, 0 * Wc:1 * Wc]   # tap kh=0 -> out[h] += y_top[h-1]
    y_mid = y[:, :, 1 * Wc:2 * Wc]   # tap kh=1 -> out[h] += y_mid[h]
    y_bot = y[:, :, 2 * Wc:3 * Wc]   # tap kh=2 -> out[h] += y_bot[h+1]

    # Height halo: shift the top/bottom taps by one row (zeros at the edges).
    acc_ref[...] = y_mid
    acc_ref[:, pl.ds(1, H - 1), :] = (
        acc_ref[:, pl.ds(1, H - 1), :] + y_top[:, 0:H - 1, :])
    acc_ref[:, pl.ds(0, H - 1), :] = (
        acc_ref[:, pl.ds(0, H - 1), :] + y_bot[:, 1:H, :])

    o_ref[...] = jnp.maximum(acc_ref[...], 0.0).astype(o_ref.dtype)  # ReLU (f32)


# ------------------------- weight restructuring -----------------------------
def _toeplitz_weight(w_oihw, W):
    """OIHW 3x3 weights -> (W*C_in, 3*W*C_out) width-Toeplitz over UNPADDED rows.

    W_all[w'*C_in + ci, kh*(W*C_out) + w*C_out + co] = weight[co, ci, kh, kw]
        with kw = w' - w + 1 and 0 <= kw < 3 (zero otherwise),
    so that  y[r] = x_row[r] @ W_all  gives the per-row-tap partial outputs and
             out[h] = y_kh0[h-1] + y_kh1[h] + y_kh2[h+1]   (rows outside -> 0)
    reproduces the pad=1 / stride=1 3x3 convolution exactly (width padding is
    absorbed by simply omitting out-of-range columns).
    """
    C_out, C_in, KH, KW = w_oihw.shape
    w_hw = jnp.transpose(w_oihw, (2, 3, 1, 0))          # (KH, KW, C_in, C_out)
    slabs = []
    for kh in range(KH):
        acc = jnp.zeros((W * C_in, W * C_out), dtype=w_oihw.dtype)
        for kw in range(KW):
            # S[w', w] = 1  iff  w' == w + kw - 1  (valid width positions only)
            S = jnp.eye(W, W, k=1 - kw, dtype=w_oihw.dtype)
            t = S[:, None, :, None] * w_hw[kh, kw][None, :, None, :]
            acc = acc + t.reshape(W * C_in, W * C_out)
        slabs.append(acc)
    return jnp.concatenate(slabs, axis=1)               # (W*C_in, KH*W*C_out)


# ------------------------------ helpers -------------------------------------
def _pick_images_per_step(N, H):
    """Largest divisor Nb of N with M = Nb*H <= ~256 MXU rows, keeping >= 2
    grid steps when N >= 2 (so ("parallel",) feeds both v7x TensorCores) and
    only batching when the (Nb, H) collapse stays sublane-aligned."""
    if H % 8 != 0:
        return 1
    target = max(1, 256 // H)
    best = 1
    for d in range(1, N + 1):
        if N % d == 0 and d <= target and (N < 2 or N // d >= 2):
            best = d
    return best


def _vmem_capacity_bytes():
    try:
        return int(pltpu.get_tpu_info().vmem_capacity_bytes)
    except Exception:
        return 64 * 1024 * 1024      # conservative: v7x per-TensorCore VMEM


# ------------------------------ conv wrapper --------------------------------
@jax.jit
def _conv3x3_relu_nhwc(x_nhwc, w_all):
    """3x3 conv (pad=1, stride=1, no bias) + ReLU.  NHWC in, NHWC (bf16) out."""
    N, H, W, C_in = x_nhwc.shape
    K = W * C_in
    assert w_all.shape[0] == K
    C_out = w_all.shape[1] // (3 * W)
    Wc = W * C_out

    Nb = _pick_images_per_step(N, H)
    grid = (N // Nb,)

    xr = x_nhwc.reshape(N, H, K)             # contiguous (W, C) collapse: free
    w_all = w_all.astype(jnp.bfloat16)

    # ---- VMEM budgeting (per-generation gate + explicit scoped limit). ----
    x_blk = Nb * H * K * xr.dtype.itemsize
    w_blk = K * 3 * Wc * 2                   # bf16 Toeplitz weight
    o_blk = Nb * H * Wc * 2
    acc_blk = Nb * H * Wc * 4
    interm = 4 * Nb * H * 3 * Wc * 4         # fused-matmul result + copies (f32)
    need = 2 * x_blk + 2 * w_blk + 2 * o_blk + acc_blk + interm
    cap = _vmem_capacity_bytes()
    if need > (cap * 7) // 8:
        # TODO(synk): row-tiled fused-im2col fallback (9 accumulating
        # (tm, C_in)@(C_in, C_out) matmuls, single-buffered weight) for large
        # W^2*C_in*C_out; required before this ships beyond toy shapes.
        raise NotImplementedError(
            f"Toeplitz conv path needs ~{need} B VMEM > budget of {cap} B; "
            "use the row-tiled im2col path for these shapes.")
    vmem_limit = int(min(max(4 * need, 32 * 1024 * 1024), (cap * 7) // 8))

    flops = 2 * N * H * K * (3 * Wc)
    bytes_accessed = (xr.size * xr.dtype.itemsize + w_all.size * 2
                      + N * H * Wc * 2)

    out = pl.pallas_call(
        functools.partial(_conv3x3_relu_kernel, Nb=Nb, H=H, Wc=Wc),
        out_shape=jax.ShapeDtypeStruct((N, H, Wc), jnp.bfloat16),
        grid_spec=pltpu.PrefetchScalarGridSpec(
            num_scalar_prefetch=0,
            grid=grid,
            in_specs=[
                pl.BlockSpec((Nb, H, K), lambda n: (n, 0, 0)),
                # Constant index_map -> the weight is DMA'd only once; its
                # (double-buffered) footprint is accounted for in `need`.
                pl.BlockSpec((K, 3 * Wc), lambda n: (0, 0)),
            ],
            out_specs=pl.BlockSpec((Nb, H, Wc), lambda n: (n, 0, 0)),
            scratch_shapes=[pltpu.VMEM((Nb, H, Wc), jnp.float32)],
        ),
        compiler_params=pltpu.CompilerParams(
            dimension_semantics=("parallel",),
            vmem_limit_bytes=vmem_limit),
        cost_estimate=pl.CostEstimate(
            flops=flops, transcendentals=0, bytes_accessed=bytes_accessed),
    )(xr, w_all)

    return out.reshape(N, H, W, C_out)       # NHWC-contiguous: free


# ------------------------------ MixedOp port --------------------------------
class MixedOp:
    """JAX/Pallas port of AGD_ST MixedOp with the 'conv' primitive
    (3x3 Conv2d, stride=1, pad=1, no bias, slimmable=False) + ReLU."""

    def __init__(self, C_in, C_out, op_idx, quantize, stride=1, key=None):
        if PRIMITIVES[op_idx] != "conv":
            raise NotImplementedError(
                "only the 'conv' primitive (3x3 conv + ReLU) is implemented")
        if quantize:
            # TODO(synk): fake-quant QConv path (quantize=True) not implemented.
            raise NotImplementedError("quantize=True is not implemented")
        if stride != 1:
            raise NotImplementedError("only stride=1 is implemented")
        self.C_in, self.C_out, self.stride = C_in, C_out, stride
        self.quantize = quantize
        if key is None:
            key = jax.random.PRNGKey(0)
        fan_in = C_in * 9
        std = (2.0 / fan_in) ** 0.5          # Kaiming init (Conv2d + ReLU)
        self.weight = std * jax.random.normal(
            key, (C_out, C_in, 3, 3), dtype=jnp.float32)
        self._w_cache = {}                   # per-W restructured bf16 weights

    def _w_all(self, W):
        W = int(W)
        if W not in self._w_cache:
            self._w_cache[W] = _toeplitz_weight(self.weight, W).astype(jnp.bfloat16)
        return self._w_cache[W]

    def forward_nhwc(self, x_nhwc):
        """Preferred entry point: NHWC in / NHWC (bf16) out, no transposes."""
        return _conv3x3_relu_nhwc(x_nhwc, self._w_all(x_nhwc.shape[2]))

    def __call__(self, x_nchw):
        # PyTorch-compatible NCHW API; layout conversion once at the boundary,
        # bf16 cast folded into it so the kernel reads half the bytes.
        # TODO(synk): multi-layer users should call forward_nhwc and stay NHWC
        # end-to-end; each transpose is a full HBM round trip.
        x_nhwc = jnp.transpose(x_nchw, (0, 2, 3, 1)).astype(jnp.bfloat16)
        y = self.forward_nhwc(x_nhwc)
        return jnp.transpose(y, (0, 3, 1, 2))

    # mirrors the torch module's auxiliary API
    def forward_flops(self, size):
        c, h, w = size
        flops = 2.0 * self.C_in * self.C_out * 9 * h * w / self.stride ** 2
        return flops, (self.C_out, h // self.stride, w // self.stride)

    def forward_latency(self, size):
        # TODO(synk): no hardware latency lookup table in this port.
        raise NotImplementedError("forward_latency table not available")


# ---------------------------------- main -----------------------------------
if __name__ == "__main__":
    key = jax.random.PRNGKey(0)
    kx, kw = jax.random.split(key)

    N, C_in, H, W = 2, 4, 16, 16
    C_out = 8
    x = jax.random.normal(kx, (N, C_in, H, W), dtype=jnp.float32)

    op = MixedOp(C_in, C_out, op_idx=1, quantize=False, stride=1, key=kw)
    y = jax.block_until_ready(op(x))
    assert y.shape == (N, C_out, H, W), y.shape

    # Pure-JAX f32 reference: Conv2d(3x3, pad=1, stride=1, no bias) + ReLU.
    ref = jax.lax.conv_general_dilated(
        x, op.weight, window_strides=(1, 1), padding="SAME",
        dimension_numbers=("NCHW", "OIHW", "NCHW"))
    ref = jnp.maximum(ref, 0.0)

    # bf16 activations/weights/output with f32 MXU accumulation -> loose tol.
    yf = y.astype(jnp.float32)
    max_err = float(jnp.max(jnp.abs(yf - ref)))
    assert jnp.allclose(yf, ref, atol=5e-2, rtol=5e-2), max_err

    print("KERNEL_OK")
</pallas_src>

<mosaic_0001>
module attributes {stable_mosaic.version = 11 : i64} {
  func.func @_conv3x3_relu_kernel(%arg0: i32, %arg1: memref<1x16x64xbf16, #tpu.memory_space<vmem>>, %arg2: memref<64x384xbf16, #tpu.memory_space<vmem>>, %arg3: memref<1x16x128xbf16, #tpu.memory_space<vmem>>, %arg4: memref<1x16x128xf32, #tpu.memory_space<vmem>>) attributes {dimension_semantics = [#tpu.dimension_semantics<parallel>], iteration_bounds = array<i64: 2>, scalar_prefetch = 0 : i64, scratch_operands = 1 : i64, tpu.core_type = #tpu.core_type<tc>, window_params = [{transform_indices = @transform_0, window_bounds = array<i64: 1, 16, 64>}, {pipeline_mode = #tpu.pipeline_mode<synchronous>, transform_indices = @transform_1, window_bounds = array<i64: 64, 384>}, {transform_indices = @transform_2, window_bounds = array<i64: 1, 16, 128>}]} {
    %c0 = arith.constant 0 : index
    %c0_0 = arith.constant 0 : index
    %c0_1 = arith.constant 0 : index
    %0 = vector.load %arg1[%c0, %c0_0, %c0_1] : memref<1x16x64xbf16, #tpu.memory_space<vmem>>, vector<1x16x64xbf16>
    %1 = vector.shape_cast %0 : vector<1x16x64xbf16> to vector<16x64xbf16>
    %c0_2 = arith.constant 0 : index
    %c0_3 = arith.constant 0 : index
    %2 = vector.load %arg2[%c0_2, %c0_3] : memref<64x384xbf16, #tpu.memory_space<vmem>>, vector<64x384xbf16>
    %cst = arith.constant dense<0.000000e+00> : vector<16x384xf32>
    %3 = tpu.matmul %1, %2, %cst {dimension_numbers = #tpu.dot_dimension_numbers<[1], [0], [0], [1], [0, 0, 1, 1], [], []>} : vector<16x64xbf16>, vector<64x384xbf16>, vector<16x384xf32> -> vector<16x384xf32>
    %4 = vector.shape_cast %3 : vector<16x384xf32> to vector<1x16x384xf32>
    %5 = vector.extract_strided_slice %4 {offsets = [0, 0, 0], sizes = [1, 16, 128], strides = [1, 1, 1]} : vector<1x16x384xf32> to vector<1x16x128xf32>
    %6 = vector.extract_strided_slice %4 {offsets = [0, 0, 128], sizes = [1, 16, 128], strides = [1, 1, 1]} : vector<1x16x384xf32> to vector<1x16x128xf32>
    %7 = vector.extract_strided_slice %4 {offsets = [0, 0, 256], sizes = [1, 16, 128], strides = [1, 1, 1]} : vector<1x16x384xf32> to vector<1x16x128xf32>
    %c0_4 = arith.constant 0 : index
    %c0_5 = arith.constant 0 : index
    %c0_6 = arith.constant 0 : index
    %8 = vector.load %arg4[%c0_4, %c0_5, %c0_6] : memref<1x16x128xf32, #tpu.memory_space<vmem>>, vector<1x16x128xf32>
    tpu.vector_store %arg4[%c0_4, %c0_5, %c0_6], %6 {strides = array<i32>} : memref<1x16x128xf32, #tpu.memory_space<vmem>>, vector<1x16x128xf32>,
    %c0_7 = arith.constant 0 : index
    %c1 = arith.constant 1 : index
    %c0_8 = arith.constant 0 : index
    %9 = vector.load %arg4[%c0_7, %c1, %c0_8] : memref<1x16x128xf32, #tpu.memory_space<vmem>>, vector<1x15x128xf32>
    %10 = vector.extract_strided_slice %5 {offsets = [0, 0, 0], sizes = [1, 15, 128], strides = [1, 1, 1]} : vector<1x16x128xf32> to vector<1x15x128xf32>
    %11 = arith.addf %9, %10 : vector<1x15x128xf32>
    %c0_9 = arith.constant 0 : index
    %c1_10 = arith.constant 1 : index
    %c0_11 = arith.constant 0 : index
    %12 = vector.load %arg4[%c0_9, %c1_10, %c0_11] : memref<1x16x128xf32, #tpu.memory_space<vmem>>, vector<1x15x128xf32>
    tpu.vector_store %arg4[%c0_9, %c1_10, %c0_11], %11 {strides = array<i32>} : memref<1x16x128xf32, #tpu.memory_space<vmem>>, vector<1x15x128xf32>,
    %c0_12 = arith.constant 0 : index
    %c0_13 = arith.constant 0 : index
    %c0_14 = arith.constant 0 : index
    %13 = vector.load %arg4[%c0_12, %c0_13, %c0_14] : memref<1x16x128xf32, #tpu.memory_space<vmem>>, vector<1x15x128xf32>
    %14 = vector.extract_strided_slice %7 {offsets = [0, 1, 0], sizes = [1, 15, 128], strides = [1, 1, 1]} : vector<1x16x128xf32> to vector<1x15x128xf32>
    %15 = arith.addf %13, %14 : vector<1x15x128xf32>
    %c0_15 = arith.constant 0 : index
    %c0_16 = arith.constant 0 : index
    %c0_17 = arith.constant 0 : index
    %16 = vector.load %arg4[%c0_15, %c0_16, %c0_17] : memref<1x16x128xf32, #tpu.memory_space<vmem>>, vector<1x15x128xf32>
    tpu.vector_store %arg4[%c0_15, %c0_16, %c0_17], %15 {strides = array<i32>} : memref<1x16x128xf32, #tpu.memory_space<vmem>>, vector<1x15x128xf32>,
    %c0_18 = arith.constant 0 : index
    %c0_19 = arith.constant 0 : index
    %c0_20 = arith.constant 0 : index
    %17 = vector.load %arg4[%c0_18, %c0_19, %c0_20] : memref<1x16x128xf32, #tpu.memory_space<vmem>>, vector<1x16x128xf32>
    %cst_21 = arith.constant 0.000000e+00 : f32
    %18 = vector.broadcast %cst_21 : f32 to vector<1x16x128xf32>
    %19 = arith.maximumf %17, %18 : vector<1x16x128xf32>
    %20 = arith.truncf %19 : vector<1x16x128xf32> to vector<1x16x128xbf16>
    %c0_22 = arith.constant 0 : index
    %c0_23 = arith.constant 0 : index
    %c0_24 = arith.constant 0 : index
    %21 = vector.load %arg3[%c0_22, %c0_23, %c0_24] : memref<1x16x128xbf16, #tpu.memory_space<vmem>>, vector<1x16x128xbf16>
    tpu.vector_store %arg3[%c0_22, %c0_23, %c0_24], %20 {strides = array<i32>} : memref<1x16x128xbf16, #tpu.memory_space<vmem>>, vector<1x16x128xbf16>,
    return
  }
  func.func @transform_0(%arg0: i32) -> (i32, i32, i32) {
    %c0_i32 = arith.constant 0 : i32
    %c0_i32_0 = arith.constant 0 : i32
    %c0_i32_1 = arith.constant 0 : i32
    return %arg0, %c0_i32, %c0_i32_0 : i32, i32, i32
  }
  func.func @transform_1(%arg0: i32) -> (i32, i32) {
    %c0_i32 = arith.constant 0 : i32
    %c0_i32_0 = arith.constant 0 : i32
    %c0_i32_1 = arith.constant 0 : i32
    return %c0_i32, %c0_i32_0 : i32, i32
  }
  func.func @transform_2(%arg0: i32) -> (i32, i32, i32) {
    %c0_i32 = arith.constant 0 : i32
    %c0_i32_0 = arith.constant 0 : i32
    %c0_i32_1 = arith.constant 0 : i32
    return %arg0, %c0_i32, %c0_i32_0 : i32, i32, i32
  }
}

</mosaic_0001>

<bundles_post_ra>
// kernel: _conv3x3_relu_nhwc.1
= control target key start
LH: loop header
LB: loop body
LE: loop exit
PB: predicated region body
PF: predicated region fallthrough
CT: control target
= control target key end

     0   :  { %s519_s9 = smov 0   ;;  %s579_s0 = inlined_call_operand.vmem [shape: bf16[2,16,64], index: 0, kind: input, shape index: {}]   ;;  %s580_s1 = inlined_call_operand.vmem [shape: bf16[64,384], index: 1, kind: input, shape index: {}]   ;;  %s581_s2 = inlined_call_operand.vmem [shape: bf16[2,16,128], index: 2, kind: output, shape index: {}]  }
   0x1 LB: > { %s411_s10 = sadd.s32 4294967295, %s499_s9   ;;  %p415_p0 = scmp.ge.s32.totalorder %s499_s9, 1  ;;  %s499_s9 = sphi %s519_s9, %s12_s9  }
   0x2   : > { %p112_p1 = scmp.lt.s32.totalorder %s499_s9, 3 }
   0x4   : > { %p113_p2 = pnand %p415_p0, %p112_p1 }
   0x5   : > { %p134_p3 = scmp.lt.s32.totalorder (!%p113_p2), %s411_s10, 1 }
   0x6   : > { %116 = sbr.rel (%p113_p2) target bundleno = 261 (0x105), region = 28 }
   0xb   : > { %v476_v0 = vld [vmem:[%s580_s1 + $0x4c] ss:$12 sps:$4 sm:$0xff]   ;;  %v478_v1 = vld [vmem:[%s580_s1 + $0x48] ss:$12 sps:$4 sm:$0xff]   ;;  %v501_v2 = vmov 0.0   ;;  %v502_v3 = vmov 0  }
   0xc   : > { %453 = vmatprep.subr.bf16.mxu1 %v501_v2  ;;  %268 = vmatprep.mubr.bf16.mxu0 %v502_v3  ;;  %v479_v4 = vld [vmem:[%s580_s1 + $0x34] ss:$12 sps:$4 sm:$0xff]   ;;  %v481_v5 = vld [vmem:[%s580_s1 + $0x30] ss:$12 sps:$4 sm:$0xff]   ;;  %s583_s10 = smov (!%p134_p3, %s411_s10), 1  ;;  %vm503_vm0 = vmmov 0  }
   0xd   : > { %244 = vmatprep.subr.bf16.mxu0 %v476_v0  ;;  %461 = vmatprep.mubr.msk.bf16.mxu1 %vm503_vm0, %v501_v2  ;;  %v482_v6 = vld [vmem:[%s580_s1 + $0x1c] ss:$12 sps:$4 sm:$0xff]   ;;  %v484_v8 = vld [vmem:[%s580_s1 + $0x18] ss:$12 sps:$4 sm:$0xff]   ;;  %s439_s25 = sshll.u32 %s583_s10, 3  ;;  %vm232_vm1 = vcmask 523264  }
   0xe   : > { %245 = vmatpush1.bf16.msra.mxu0 %v478_v1  ;;  %v487_v7 = vld [vmem:[%s580_s1 + $0x50] ss:$12 sps:$4 sm:$0xff]   ;;  %s138_s28 = scalar_lea.vmem %s579_s0, %s439_s25  ;;  %v490_v9 = vld [vmem:[%s580_s1 + $0x38] ss:$12 sps:$4 sm:$0xff]   ;;  %v488_v11 = vld [vmem:[%s580_s1] ss:$12 sps:$4 sm:$0xff]   ;;  %s143_s15 = scalar_lea.vmem %s581_s2, %s439_s25 }
   0xf   : > { %246 = vmatprep.subr.bf16.mxu0 %v479_v4  ;;  %454 = vmatpush3.bf16.msra.mxu1 %v487_v7  ;;  %v485_v10 = vld [vmem:[%s580_s1 + $0x4] ss:$12 sps:$4 sm:$0xff]   ;;  %v491_v12 = vld [vmem:[%s580_s1 + $0x20] ss:$12 sps:$4 sm:$0xff]   ;;  %v492_v14 = vld [vmem:[%s580_s1 + $0x8] ss:$12 sps:$4 sm:$0xff]  }
  0x10   : > { %455 = vmatprep.subr.bf16.mxu1 %v501_v2  ;;  %v489_v13 = vld [vmem:[%s138_s28] sm:$0xff]   ;;  %vm332_vm2 = vcmask 1046528  }
  0x12   : > { %247 = vmatpush1.bf16.msra.mxu0 %v481_v5 }
  0x13   : > { %248 = vmatprep.subr.bf16.mxu0 %v482_v6  ;;  %456 = vmatpush3.bf16.msra.mxu1 %v490_v9 }
  0x14   : > { %457 = vmatprep.subr.bf16.mxu1 %v501_v2 }
  0x16   : > { %249 = vmatpush1.bf16.msra.mxu0 %v484_v8 }
  0x17   : > { %250 = vmatprep.subr.bf16.mxu0 %v485_v10  ;;  %458 = vmatpush3.bf16.msra.mxu1 %v491_v12 }
  0x18   : > { %459 = vmatprep.subr.bf16.mxu1 %v501_v2 }
  0x1a   : > { %251 = vmatpush1.bf16.msra.mxu0 %v488_v11 }
  0x1b   : > { %460 = vmatpush3.bf16.msra.mxu1 %v492_v14 }
  0x1d   : > { %433 = vmatmul.mubr.msk.bf16.vlgmr.msra.gmra.mxu0 %vm232_vm1, %v489_v13 }
  0x1e   : > { %462 = vmatmul.mubr.msk.bf16.vlgmr.msra.gmra.mxu1 %vm232_vm1, %v489_v13 }
  0xdd   : > { %v270_v15 = vpop.f32.mrf.mxu0 }
  0xde   : > { %v313_v18 = vpop.f32.mrf.mxu1 }
  0xdf   : > { %v272_v16 = vpop.f32.mrf.mxu0  ;;  %v333_v27 = vrot.slane %v313_v18, 1 }
  0xe0   : > { %320 = vst [vmem:[#allocation2] sm:$0xff] %v272_v16  ;;  %v463_v20 = vpop.f32.mrf.mxu1 }
  0xe1   : > { %v274_v17 = vpop.f32.mrf.mxu0 }
  0xe2   : > { %v316_v21 = vpop.f32.mrf.mxu1 }
  0xe3   : > { %v276_v19 = vpop.f32.mrf.mxu0  ;;  %v334_v28 = vrot.slane %v316_v21, 1 }
  0xe4   : > { %321 = vst [vmem:[#allocation2 + $0x8] sm:$0xff] %v276_v19  ;;  %v464_v22 = vpop.f32.mrf.mxu1 }
  0xe5   : > { %v335_v31 = vsel %vm332_vm2, %v333_v27, %v334_v28 }
  0xeb   : > { %v322_v23 = vld [vmem:[#allocation2 + $0x1] sm:$0xff]  ;;  %v323_v24 = vld [vmem:[#allocation2 + $0x9] sm:$0x7f] }
  0xec   : > { %v324_v25 = vadd.f32 %v322_v23, %v270_v15  ;;  %v325_v26 = vadd.f32 %v323_v24, %v274_v17 }
  0xee   : > { %326 = vst [vmem:[#allocation2 + $0x1] sm:$0xff] %v324_v25  ;;  %327 = vst [vmem:[#allocation2 + $0x9] sm:$0x7f] %v325_v26 }
  0xf5   : > { %v328_v29 = vld [vmem:[#allocation2] sm:$0xff]  ;;  %v329_v30 = vld [vmem:[#allocation2 + $0x8] sm:$0x7f] }
  0xf6   : > { %v338_v32 = vadd.f32 %v335_v31, %v328_v29  ;;  %v339_v33 = vadd.f32 %v334_v28, %v329_v30 }
  0xf8   : > { %340 = vst [vmem:[#allocation2] sm:$0xff] %v338_v32  ;;  %341 = vst [vmem:[#allocation2 + $0x8] sm:$0x7f] %v339_v33  ;;  %v344_v35 = vmax.f32 %v338_v32, 0.0 }
  0xff   : > { %v343_v34 = vld [vmem:[#allocation2 + $0x8] sm:$0xff] }
 0x100   : > { %v345_v36 = vmax.f32 %v343_v34, 0.0 }
 0x102   : > { %v446_v37 = vpack.c.bf16 %v345_v36, %v344_v35 }
 0x104   : > { %447 = vst [vmem:[%s143_s15] sm:$0xff] %v446_v37  }
 0x105 PF: > { %s12_s9 = sadd.s32 1, %s499_s9  }
 0x106   : > { %p9_p4 = scmp.ge.s32.totalorder %s12_s9, 4  }
 0x108   :  { %11 = sbr.rel (!%p9_p4) target bundleno = 1 (0x1), region = 58 }

</bundles_post_ra>
